<compile_context>
chip_gen: v7x
topology: tpu7x:2x2x1
jax: 0.10.0
libtpu: 0.0.40
codegen_flags: <defaults>
</compile_context>

<pallas_src>
import functools

import jax
import jax.numpy as jnp
from jax.experimental import pallas as pl
from jax.experimental.pallas import tpu as pltpu


# ---------------------------------------------------------------------------
# Hardware / tile selection helpers
# ---------------------------------------------------------------------------

def _block_budget_bytes():
    """Per-block VMEM budget, generation aware (v7x has half the VMEM)."""
    try:
        vmem = pltpu.get_tpu_info().vmem_capacity_bytes
    except Exception:
        vmem = 128 << 20
    if vmem <= (64 << 20):      # v7x: 64 MiB per TensorCore
        return 3 << 20          # 8 live block copies ~ 24 MiB
    return 4 << 20              # v5e / v6e: 128 MiB physical VMEM


def _vmem_limit_bytes(budget):
    # 2 inputs + 2 outputs, double-buffered ~= 8 live block copies, plus the
    # tiny mask buffers and Mosaic-internal scratch headroom.
    return 8 * budget + (16 << 20)


def _sublanes(itemsize):
    # 8 rows/vreg for f32, 16 for bf16, 32 for int8 (sublane packing).
    return max(8, 32 // itemsize)


def _best_lane_tile(lanes, itemsize, budget, sub):
    """Largest multiple of 128 that exactly divides `lanes` and keeps a
    (sub, tl) slab within the per-block budget.  None if no such divisor."""
    cap = max(128, (budget // (sub * itemsize)) // 128 * 128)
    best = None
    tl = 128
    limit = min(lanes, cap)
    while tl <= limit:
        if lanes % tl == 0:
            best = tl
        tl += 128
    return best


def _pick_tiles(rows, lanes, itemsize, budget):
    """Lane-dense (tr, tl) tile for a (rows, lanes) array."""
    sub = _sublanes(itemsize)

    # Lane tile: exact 128-multiple divisor when possible (unmasked stores,
    # no padded edge DMA); otherwise full-dim if small, else ragged 128-align.
    tl = _best_lane_tile(lanes, itemsize, budget, sub)
    if tl is None:
        if lanes < 128 or lanes * itemsize * sub <= budget:
            tl = lanes                                   # full-dim exception
        else:
            tl = max(128, (budget // (sub * itemsize)) // 128 * 128)

    # Row tile: as many rows as the budget allows.
    if rows <= sub:
        tr = rows                                        # full-dim exception
    else:
        tr = max(sub, budget // (tl * itemsize))
        tr = max(sub, (min(tr, rows) // sub) * sub)
        # v7x megacore: keep >= 2 row blocks when rows allow it so the
        # "parallel" axis can be sharded across both TensorCores.
        if pl.cdiv(rows, tr) < 2 and rows >= 2 * sub:
            half = pl.cdiv(rows, 2)
            tr = max(sub, ((half + sub - 1) // sub) * sub)
    return tr, tl


# ---------------------------------------------------------------------------
# Dense (functional) path
# ---------------------------------------------------------------------------

def _dense_kernel(m_ref, x1_ref, x2_ref, o1_ref, o2_ref):
    # Mask is a tiny precomputed per-row ((tr,1)) or per-lane ((1,tl)) int32
    # vector; jnp.where broadcasts it over the data tile.  Pure VPU select —
    # enormous slack in this DMA-bound kernel.
    swap = m_ref[...] != 0
    x1 = x1_ref[...]
    x2 = x2_ref[...]
    o1_ref[...] = jnp.where(swap, x2, x1)
    o2_ref[...] = jnp.where(swap, x1, x2)


@functools.partial(jax.jit, static_argnames=("p_int",))
def _channel_exchange_dense(x1, x2, *, p_int):
    N, C, H, W = x1.shape
    HW = H * W
    itemsize = x1.dtype.itemsize
    budget = _block_budget_bytes()

    ch_swap = ((jnp.arange(C, dtype=jnp.int32) % p_int) == 0).astype(jnp.int32)

    if HW % 128 == 0:
        # Spatial dim is already lane-dense: flatten to (N*C, HW); mask is
        # per-row (channel = row % C).
        rows, lanes = N * C, HW
        mask = jnp.tile(ch_swap, N).reshape(rows, 1)
        row_mask = True
    else:
        # Awkward spatial size: flatten to (N, C*HW) so the lane dim is large
        # (and usually 128-aligned); mask is per-lane (channel = lane // HW).
        rows, lanes = N, C * HW
        mask = jnp.repeat(ch_swap, HW).reshape(1, lanes)
        row_mask = False

    x1f = x1.reshape(rows, lanes)
    x2f = x2.reshape(rows, lanes)

    tr, tl = _pick_tiles(rows, lanes, itemsize, budget)
    grid = (pl.cdiv(rows, tr), pl.cdiv(lanes, tl))
    data_blk = pl.BlockSpec((tr, tl), lambda i, j: (i, j))
    if row_mask:
        mask_blk = pl.BlockSpec((tr, 1), lambda i, j: (i, 0))
    else:
        mask_blk = pl.BlockSpec((1, tl), lambda i, j: (0, j))

    bytes_accessed = 4 * rows * lanes * itemsize + mask.size * 4
    o1, o2 = pl.pallas_call(
        _dense_kernel,
        out_shape=(jax.ShapeDtypeStruct((rows, lanes), x1.dtype),
                   jax.ShapeDtypeStruct((rows, lanes), x2.dtype)),
        grid=grid,
        in_specs=[mask_blk, data_blk, data_blk],
        out_specs=(data_blk, data_blk),
        compiler_params=pltpu.CompilerParams(
            dimension_semantics=("parallel", "parallel"),
            vmem_limit_bytes=_vmem_limit_bytes(budget)),
        cost_estimate=pl.CostEstimate(flops=0, transcendentals=0,
                                      bytes_accessed=bytes_accessed),
    )(mask, x1f, x2f)
    return o1.reshape(N, C, H, W), o2.reshape(N, C, H, W)


# ---------------------------------------------------------------------------
# Exchange-only (aliased / donating) path
# ---------------------------------------------------------------------------

def _swap_only_kernel(x1_ref, x2_ref, o1_ref, o2_ref):
    # Pure copy of the exchanged channels; non-exchanged channels are carried
    # over untouched through the input/output alias.
    o1_ref[...] = x2_ref[...]
    o2_ref[...] = x1_ref[...]


@functools.partial(jax.jit, static_argnames=("p_int",), donate_argnums=(0, 1))
def _channel_exchange_inplace(x1, x2, *, p_int):
    N, C, H, W = x1.shape
    HW = H * W
    G = C // p_int            # channel groups; exchanged channel = first of each
    R = N * G
    L = p_int * HW            # exchanged channel occupies lanes [0, HW) per row
    itemsize = x1.dtype.itemsize
    budget = _block_budget_bytes()
    sub = _sublanes(itemsize)

    x1f = x1.reshape(R, L)
    x2f = x2.reshape(R, L)

    tl = _best_lane_tile(HW, itemsize, budget, sub)   # caller guarantees non-None
    if R <= sub:
        tr = R
    else:
        tr = max(sub, budget // (tl * itemsize))
        tr = max(sub, (min(tr, R) // sub) * sub)
        if pl.cdiv(R, tr) < 2 and R >= 2 * sub:       # v7x megacore balance
            half = pl.cdiv(R, 2)
            tr = max(sub, ((half + sub - 1) // sub) * sub)

    # The lane grid only covers lanes [0, HW): only exchanged channels move.
    grid = (pl.cdiv(R, tr), HW // tl)
    blk = pl.BlockSpec((tr, tl), lambda i, j: (i, j))

    o1, o2 = pl.pallas_call(
        _swap_only_kernel,
        out_shape=(jax.ShapeDtypeStruct((R, L), x1.dtype),
                   jax.ShapeDtypeStruct((R, L), x2.dtype)),
        grid=grid,
        in_specs=[blk, blk],
        out_specs=(blk, blk),
        input_output_aliases={0: 0, 1: 1},
        compiler_params=pltpu.CompilerParams(
            dimension_semantics=("parallel", "parallel"),
            vmem_limit_bytes=_vmem_limit_bytes(budget)),
        cost_estimate=pl.CostEstimate(flops=0, transcendentals=0,
                                      bytes_accessed=4 * R * HW * itemsize),
    )(x1f, x2f)
    return o1.reshape(N, C, H, W), o2.reshape(N, C, H, W)


# ---------------------------------------------------------------------------
# Public entry point
# ---------------------------------------------------------------------------

def channel_exchange(x1, x2, p=0.5, donate=False):
    """ChannelExchange forward.

    donate=False : pure-functional dense kernel (inputs preserved).
    donate=True  : outputs alias the (donated) input buffers and only the
                   exchanged channels are DMA'd (~p of the HBM traffic).
                   Callers must not reuse x1 / x2 afterwards.
    """
    assert x1.shape == x2.shape and x1.dtype == x2.dtype
    assert 0.0 < p <= 1.0
    p_int = int(1 / p)
    _, C, H, W = x1.shape
    HW = H * W
    itemsize = x1.dtype.itemsize
    # Aliased path only when: channel groups are exact, HW has a 128 divisor
    # (lane-dense unmasked stores), and the per-row contiguous writeback run
    # is >= 1 KiB so the strided output DMA doesn't erase the traffic saving.
    # TODO(synk): extend the aliased path to HW without a 128 divisor via a
    # (N*G, p_int, HW) 3-D blocking once its layout cost is validated.
    if (donate and C % p_int == 0 and HW % 128 == 0
            and HW * itemsize >= 1024):
        return _channel_exchange_inplace(x1, x2, p_int=p_int)
    return _channel_exchange_dense(x1, x2, p_int=p_int)


def _reference(x1, x2, p=0.5):
    p_int = int(1 / p)
    C = x1.shape[1]
    mask = ((jnp.arange(C) % p_int) == 0)[None, :, None, None]
    return jnp.where(mask, x2, x1), jnp.where(mask, x1, x2)


if __name__ == "__main__":
    key = jax.random.PRNGKey(0)

    def check(name, shape, p, donate):
        k1, k2 = jax.random.split(jax.random.fold_in(key, hash(name) % 1000))
        a = jax.random.normal(k1, shape, dtype=jnp.float32)
        b = jax.random.normal(k2, shape, dtype=jnp.float32)
        r1, r2 = _reference(a, b, p=p)
        # Pass fresh copies when donating so a/b stay usable for the check.
        o1, o2 = channel_exchange(a + 0.0 if donate else a,
                                  b + 0.0 if donate else b,
                                  p=p, donate=donate)
        jax.block_until_ready((o1, o2))
        assert jnp.allclose(o1, r1), f"{name}: out_x1 mismatch"
        assert jnp.allclose(o2, r2), f"{name}: out_x2 mismatch"

    # Dense main path (HW % 128 == 0, per-row mask).
    check("dense_main", (2, 4, 16, 16), p=0.5, donate=False)
    # Dense fallback path (HW % 128 != 0 -> (N, C*HW) flatten, per-lane mask).
    check("dense_lane", (2, 32, 10, 10), p=0.25, donate=False)
    # Tiny ragged shape (no 128-multiple anywhere): full-dim blocks.
    check("dense_ragged", (2, 3, 5, 5), p=0.5, donate=False)
    # Aliased / exchange-only path at p = 1/2 and p = 1/4.
    check("donate_p2", (2, 4, 16, 16), p=0.5, donate=True)
    check("donate_p4", (2, 8, 16, 16), p=0.25, donate=True)

    print("KERNEL_OK")
</pallas_src>

<mosaic_0001>
module attributes {stable_mosaic.version = 11 : i64} {
  func.func @_dense_kernel(%arg0: i32, %arg1: i32, %arg2: memref<8x1xi32, #tpu.memory_space<vmem>>, %arg3: memref<8x256xf32, #tpu.memory_space<vmem>>, %arg4: memref<8x256xf32, #tpu.memory_space<vmem>>, %arg5: memref<8x256xf32, #tpu.memory_space<vmem>>, %arg6: memref<8x256xf32, #tpu.memory_space<vmem>>) attributes {dimension_semantics = [#tpu.dimension_semantics<parallel>, #tpu.dimension_semantics<parallel>], iteration_bounds = array<i64: 1, 1>, scalar_prefetch = 0 : i64, scratch_operands = 0 : i64, tpu.core_type = #tpu.core_type<tc>, window_params = [{transform_indices = @transform_0, window_bounds = array<i64: 8, 1>}, {transform_indices = @transform_1, window_bounds = array<i64: 8, 256>}, {transform_indices = @transform_2, window_bounds = array<i64: 8, 256>}, {transform_indices = @transform_3, window_bounds = array<i64: 8, 256>}, {transform_indices = @transform_4, window_bounds = array<i64: 8, 256>}]} {
    %c0 = arith.constant 0 : index
    %c0_0 = arith.constant 0 : index
    %0 = vector.load %arg2[%c0, %c0_0] : memref<8x1xi32, #tpu.memory_space<vmem>>, vector<8x1xi32>
    %c0_i32 = arith.constant 0 : i32
    %1 = vector.broadcast %c0_i32 : i32 to vector<8x1xi32>
    %2 = arith.cmpi ne, %0, %1 : vector<8x1xi32>
    %c0_1 = arith.constant 0 : index
    %c0_2 = arith.constant 0 : index
    %3 = vector.load %arg3[%c0_1, %c0_2] : memref<8x256xf32, #tpu.memory_space<vmem>>, vector<8x256xf32>
    %c0_3 = arith.constant 0 : index
    %c0_4 = arith.constant 0 : index
    %4 = vector.load %arg4[%c0_3, %c0_4] : memref<8x256xf32, #tpu.memory_space<vmem>>, vector<8x256xf32>
    %5 = vector.shape_cast %2 : vector<8x1xi1> to vector<8x1xi1>
    %6 = vector.broadcast %5 : vector<8x1xi1> to vector<8x256xi1>
    %7 = arith.select %6, %4, %3 : vector<8x256xi1>, vector<8x256xf32>
    %c0_5 = arith.constant 0 : index
    %c0_6 = arith.constant 0 : index
    %8 = vector.load %arg5[%c0_5, %c0_6] : memref<8x256xf32, #tpu.memory_space<vmem>>, vector<8x256xf32>
    tpu.vector_store %arg5[%c0_5, %c0_6], %7 {strides = array<i32>} : memref<8x256xf32, #tpu.memory_space<vmem>>, vector<8x256xf32>,
    %9 = vector.shape_cast %2 : vector<8x1xi1> to vector<8x1xi1>
    %10 = vector.broadcast %9 : vector<8x1xi1> to vector<8x256xi1>
    %11 = arith.select %10, %3, %4 : vector<8x256xi1>, vector<8x256xf32>
    %c0_7 = arith.constant 0 : index
    %c0_8 = arith.constant 0 : index
    %12 = vector.load %arg6[%c0_7, %c0_8] : memref<8x256xf32, #tpu.memory_space<vmem>>, vector<8x256xf32>
    tpu.vector_store %arg6[%c0_7, %c0_8], %11 {strides = array<i32>} : memref<8x256xf32, #tpu.memory_space<vmem>>, vector<8x256xf32>,
    return
  }
  func.func @transform_0(%arg0: i32, %arg1: i32) -> (i32, i32) {
    %c0_i32 = arith.constant 0 : i32
    %c0_i32_0 = arith.constant 0 : i32
    return %arg0, %c0_i32 : i32, i32
  }
  func.func @transform_1(%arg0: i32, %arg1: i32) -> (i32, i32) {
    %c0_i32 = arith.constant 0 : i32
    return %arg0, %arg1 : i32, i32
  }
  func.func @transform_2(%arg0: i32, %arg1: i32) -> (i32, i32) {
    %c0_i32 = arith.constant 0 : i32
    return %arg0, %arg1 : i32, i32
  }
  func.func @transform_3(%arg0: i32, %arg1: i32) -> (i32, i32) {
    %c0_i32 = arith.constant 0 : i32
    return %arg0, %arg1 : i32, i32
  }
  func.func @transform_4(%arg0: i32, %arg1: i32) -> (i32, i32) {
    %c0_i32 = arith.constant 0 : i32
    return %arg0, %arg1 : i32, i32
  }
}

</mosaic_0001>

<bundles_post_ra>
// kernel: tile.8
= control target key start
LH: loop header
LB: loop body
LE: loop exit
PB: predicated region body
PF: predicated region fallthrough
CT: control target
= control target key end

     0   :  { %s22_s0 = inlined_call_operand.vmem [shape: s32[4], index: 0, kind: input, shape index: {}]   ;;  %s23_s1 = inlined_call_operand.vmem [shape: s32[2,4], index: 1, kind: output, shape index: {}]  }
   0x1   :  { %v4_v0 = vld [vmem:[%s22_s0] ss:$0 sm:$0xff] }
   0x2   :  { %5 = vst [vmem:[%s23_s1] sm:$0x3] %v4_v0 }

// kernel: tile.0
= control target key start
LH: loop header
LB: loop body
LE: loop exit
PB: predicated region body
PF: predicated region fallthrough
CT: control target
= control target key end

     0   :  { %s34_s8 = smov 125   ;;  %vm7_vm0 = vcmask 7168   ;;  %s35_s11 = smov 126   ;;  %s61_s0 = inlined_call_operand.vmem [shape: s32[2,4], index: 0, kind: input, shape index: {}]   ;;  %s62_s1 = inlined_call_operand.vmem [shape: s32[8,1], index: 1, kind: output, shape index: {}]  }
   0x1   :  { %v4_v0 = vld [vmem:[%s61_s0] sm:$0x3]  ;;  %s33_s0 = smov 127  }
   0x2   :  { %5 = vst [vmem:[#allocation0] sm:$0x3] %v4_v0 }
   0x9   :  { %v9_v1 = vld [vmem:[#allocation0] sm:$0x3]  }
   0xa   :  { %v21_v2 = vld [vmem:[#allocation0] sm:$0x3]   ;;  %10 = vrot.lane.b32.xlu0 %v9_v1, %s33_s0 }
   0xb   :  { %22 = vrot.lane.b32.xlu1 %v21_v2, %s34_s8  ;;  %v6_v3 = vld [vmem:[#allocation0] sm:$0x3]  }
   0xc   :  { %v15_v4 = vld [vmem:[#allocation0] sm:$0x3]   ;;  %8 = vst.msk [vmem:[%s62_s1] ss:$4 sm:$0x3] %vm7_vm0, %v6_v3  }
   0xe   :  { %16 = vrot.lane.b32.xlu0 %v15_v4, %s35_s11 }
  0x7c   :  { %v11_v5 = vpop.permute.xlu0 %10  }
  0x7d   :  { %v23_v6 = vpop.permute.xlu1 %22   ;;  %27 = vst.msk [vmem:[%s62_s1 + $0x1] ss:$4 sm:$0x3] %vm7_vm0, %v11_v5  }
  0x7e   :  { %29 = vst.msk [vmem:[%s62_s1 + $0x3] ss:$4 sm:$0x3] %vm7_vm0, %v23_v6  }
  0x80   :  { %v17_v7 = vpop.permute.xlu0 %16  }
  0x81   :  { %28 = vst.msk [vmem:[%s62_s1 + $0x2] ss:$4 sm:$0x3] %vm7_vm0, %v17_v7  }

// kernel: _channel_exchange_dense.1
= control target key start
LH: loop header
LB: loop body
LE: loop exit
PB: predicated region body
PF: predicated region fallthrough
CT: control target
= control target key end

     0   :  { %v45_v0 = vmov 0   ;;  %s98_s0 = inlined_call_operand.vmem [shape: s32[8,1], index: 0, kind: input, shape index: {}]   ;;  %s99_s1 = inlined_call_operand.vmem [shape: f32[8,256], index: 1, kind: input, shape index: {}]   ;;  %s100_s2 = inlined_call_operand.vmem [shape: f32[8,256], index: 2, kind: input, shape index: {}]   ;;  %s101_s3 = inlined_call_operand.vmem [shape: f32[8,256], index: 3, kind: output, shape index: {0}]   ;;  %s102_s4 = inlined_call_operand.vmem [shape: f32[8,256], index: 4, kind: output, shape index: {1}]  }
   0x1   :  { %44 = vset.pattern.permute.xlu0 %v45_v0  ;;  %v16_v1 = vld [vmem:[%s98_s0] sm:$0xff]  ;;  %v19_v4 = vld [vmem:[%s99_s1 + $0x8] sm:$0xff] }
   0x2   :  { %vm17_vm0 = vcmp.ne.s32.totalorder %v16_v1, 0  ;;  %v18_v3 = vld [vmem:[%s99_s1] sm:$0xff]  ;;  %v21_v6 = vld [vmem:[%s100_s2 + $0x8] sm:$0xff] }
   0x3   :  { %v22_v2 = vsel %vm17_vm0, 1, %v45_v0  ;;  %v20_v5 = vld [vmem:[%s100_s2] sm:$0xff] }
   0x4   :  { %24 = vperm.xlu0 %44, %v22_v2  }
  0x83   :  { %v25_v7 = vpop.permute.xlu0 %24 }
  0x84   :  { %vm26_vm1 = vcmp.eq.s32.totalorder %v25_v7, 1 }
  0x85   :  { %v27_v8 = vsel %vm26_vm1, %v20_v5, %v18_v3  ;;  %v28_v9 = vsel %vm26_vm1, %v21_v6, %v19_v4  ;;  %v31_v10 = vsel %vm26_vm1, %v18_v3, %v20_v5  ;;  %v32_v11 = vsel %vm26_vm1, %v19_v4, %v21_v6 }
  0x86   :  { %29 = vst [vmem:[%s101_s3] sm:$0xff] %v27_v8  ;;  %30 = vst [vmem:[%s101_s3 + $0x8] sm:$0xff] %v28_v9 }
  0x87   :  { %33 = vst [vmem:[%s102_s4] sm:$0xff] %v31_v10  ;;  %34 = vst [vmem:[%s102_s4 + $0x8] sm:$0xff] %v32_v11 }

</bundles_post_ra>
